<compile_context>
chip_gen: v7x
topology: tpu7x:2x2x1
jax: 0.10.0
libtpu: 0.0.40
codegen_flags: <defaults>
</compile_context>

<pallas_src>
import functools
import math

import jax
import jax.numpy as jnp
from jax.experimental import pallas as pl
from jax.experimental.pallas import tpu as pltpu

_NEG_BIG = -1e30   # bias for padded logit lanes: exp(shifted) underflows to exactly 0
_LANE = 128


def _round_up(x, m):
    return ((x + m - 1) // m) * m


def _lstm_tagger_kernel(ids_ref, emb_ref, w_ref, b_ref, out_ref, x_vmem, *, hidden_dim):
    """Fused forward: in-kernel gather, L single-step LSTM cells, linear head, log_softmax.

    ids_ref : SMEM (S,)            int32 token ids
    emb_ref : VMEM (V, Kdim)       embedding table, cols E..Kdim zero-padded
    w_ref   : VMEM (L+1, Kdim, P)  layers 0..L-1: [W_i | W_g | W_o]; layer L: linear head
    b_ref   : VMEM (L+1, P)        matching biases; linear row has -1e30 in padded lanes
    out_ref : VMEM (S, P)          log-probabilities, real classes in [:, :T]
    x_vmem  : VMEM (S, Kdim)       scratch for the gathered embeddings
    """
    H = hidden_dim
    S, Kdim = x_vmem.shape
    L = w_ref.shape[0] - 1

    # ---- embedding gather: dynamic row slices of the VMEM-resident table ----
    for s in range(S):                                            # S is small & static
        x_vmem[pl.ds(s, 1), :] = emb_ref[pl.ds(ids_ref[s], 1), :]

    b_all = b_ref[...]                                            # (L+1, P), loaded once
    h = x_vmem[...]                                               # (S, Kdim) float32

    # ---- stacked single-step LSTM cells (h_prev = c_prev = 0) ----
    # gate layout after wrapper packing: [i | g | o]  (f-gate dropped: it multiplies c_prev==0)
    for l in range(L):
        gates = jnp.dot(h, w_ref[l], preferred_element_type=jnp.float32) + b_all[l:l + 1, :]
        i = jax.nn.sigmoid(gates[:, 0 * H:1 * H])
        g = jnp.tanh(gates[:, 1 * H:2 * H])
        o = jax.nn.sigmoid(gates[:, 2 * H:3 * H])
        h = o * jnp.tanh(i * g)                                   # c = f*c_prev + i*g = i*g
        if Kdim > H:                                              # only if embedding_dim > hidden_dim
            h = jnp.concatenate([h, jnp.zeros((S, Kdim - H), jnp.float32)], axis=1)

    # ---- lane-padded linear head + log_softmax over the full P lanes ----
    logits = jnp.dot(h, w_ref[L], preferred_element_type=jnp.float32) + b_all[L:L + 1, :]
    m = jnp.max(logits, axis=1, keepdims=True)
    shifted = logits - m
    lse = jnp.log(jnp.sum(jnp.exp(shifted), axis=1, keepdims=True))
    out_ref[...] = shifted - lse


def lstm_tagger_forward(token_ids, packed):
    """Run the fused kernel and slice the lane-padded log-probs back to (S, T)."""
    emb, w_all, b_all = packed["emb"], packed["w_all"], packed["b_all"]
    H, T = packed["hidden_dim"], packed["target_size"]
    S = token_ids.shape[0]
    Kdim = emb.shape[1]
    P = w_all.shape[2]

    out = pl.pallas_call(
        functools.partial(_lstm_tagger_kernel, hidden_dim=H),
        out_shape=jax.ShapeDtypeStruct((S, P), jnp.float32),
        in_specs=[
            pl.BlockSpec(memory_space=pltpu.MemorySpace.SMEM),   # token ids (scalars)
            pl.BlockSpec(memory_space=pltpu.MemorySpace.VMEM),   # embedding table
            pl.BlockSpec(memory_space=pltpu.MemorySpace.VMEM),   # packed weights
            pl.BlockSpec(memory_space=pltpu.MemorySpace.VMEM),   # packed biases
        ],
        out_specs=pl.BlockSpec(memory_space=pltpu.MemorySpace.VMEM),
        scratch_shapes=[pltpu.VMEM((S, Kdim), jnp.float32)],
    )(token_ids, emb, w_all, b_all)
    return out[:, :T]


def make_params(key, vocab_size, embedding_dim, hidden_dim, target_size):
    """Synthetic parameters matching the nn.Module's shapes (weights stored input-major = W.T)."""
    L, H = target_size, hidden_dim                     # num_layers == target_size in the module
    ks = jax.random.split(key, 3 + 3 * L)
    bound = 1.0 / math.sqrt(H)
    u = lambda k, shape: jax.random.uniform(k, shape, jnp.float32, minval=-bound, maxval=bound)

    w_ih, b = [], []
    for l in range(L):
        in_dim = embedding_dim if l == 0 else H
        w_ih.append(u(ks[3 + 3 * l], (in_dim, 4 * H)))                      # == W_ih_l{l}.T
        b.append(u(ks[4 + 3 * l], (4 * H,)) + u(ks[5 + 3 * l], (4 * H,)))   # b_ih + b_hh
    return {
        "embedding": jax.random.normal(ks[0], (vocab_size, embedding_dim), jnp.float32),
        "w_ih": w_ih,
        "b": b,
        "w_lin": u(ks[1], (H, target_size)),           # == W_linear.T
        "b_lin": u(ks[2], (target_size,)),
    }


def pack_params(params, embedding_dim, hidden_dim, target_size):
    """Repack into the kernel layout: padded table, one weight slab, one bias slab.

    Only the i/g/o gate columns are kept (the f gate scales c_prev == 0).  The linear head is
    lane-padded to a multiple of 128; padded logit lanes get a -1e30 bias so they contribute
    exactly 0 to the softmax denominator.
    """
    E, H, T = embedding_dim, hidden_dim, target_size
    L = len(params["w_ih"])
    Kdim = max(E, H)                                   # shared contraction dim for all matmuls
    G = 3 * H                                          # [i | g | o] gate width
    P = max(_LANE, _round_up(G, _LANE), _round_up(T, _LANE))

    emb = jnp.zeros((params["embedding"].shape[0], Kdim), jnp.float32)
    emb = emb.at[:, :E].set(params["embedding"])

    w_all = jnp.zeros((L + 1, Kdim, P), jnp.float32)
    b_all = jnp.zeros((L + 1, P), jnp.float32)
    for l in range(L):
        W, bias = params["w_ih"][l], params["b"][l]
        in_dim = W.shape[0]
        w_igo = jnp.concatenate([W[:, 0:H], W[:, 2 * H:3 * H], W[:, 3 * H:4 * H]], axis=1)
        b_igo = jnp.concatenate([bias[0:H], bias[2 * H:3 * H], bias[3 * H:4 * H]])
        w_all = w_all.at[l, :in_dim, :G].set(w_igo)
        b_all = b_all.at[l, :G].set(b_igo)

    w_all = w_all.at[L, :H, :T].set(params["w_lin"])
    b_all = b_all.at[L, :].set(jnp.full((P,), _NEG_BIG, jnp.float32))
    b_all = b_all.at[L, :T].set(params["b_lin"])

    return {"emb": emb, "w_all": w_all, "b_all": b_all,
            "hidden_dim": H, "target_size": T}


def reference_forward(token_ids, params, hidden_dim):
    """Pure-JAX reference of the PyTorch forward (full i,f,g,o gates; h_prev = c_prev = 0)."""
    H = hidden_dim
    h = params["embedding"][token_ids]
    for W, b in zip(params["w_ih"], params["b"]):
        gates = h @ W + b
        i = jax.nn.sigmoid(gates[:, 0 * H:1 * H])
        # f gate: sigmoid(gates[:, H:2H]) * c_prev == 0 for these length-1 sequences.
        g = jnp.tanh(gates[:, 2 * H:3 * H])
        o = jax.nn.sigmoid(gates[:, 3 * H:4 * H])
        h = o * jnp.tanh(i * g)
    logits = h @ params["w_lin"] + params["b_lin"]
    return jax.nn.log_softmax(logits, axis=1)


if __name__ == "__main__":
    SEQ_LEN = 8          # len(x): number of tokens in the input sentence
    VOCAB_SIZE = 16
    EMBEDDING_DIM = 16
    HIDDEN_DIM = 32
    TARGET_SIZE = 4      # also the LSTM num_layers, as written in the module

    key = jax.random.PRNGKey(0)
    k_params, k_tokens = jax.random.split(key)
    params = make_params(k_params, VOCAB_SIZE, EMBEDDING_DIM, HIDDEN_DIM, TARGET_SIZE)
    packed = pack_params(params, EMBEDDING_DIM, HIDDEN_DIM, TARGET_SIZE)
    token_ids = jax.random.randint(k_tokens, (SEQ_LEN,), 0, VOCAB_SIZE, dtype=jnp.int32)

    out = lstm_tagger_forward(token_ids, packed)
    out = jax.block_until_ready(out)

    ref = reference_forward(token_ids, params, HIDDEN_DIM)
    assert out.shape == (SEQ_LEN, TARGET_SIZE)
    assert jnp.allclose(out, ref, atol=1e-5, rtol=1e-5), "Pallas output mismatch vs reference"

    print("KERNEL_OK")
</pallas_src>

<mosaic_0001>
module attributes {stable_mosaic.version = 11 : i64} {
  func.func @_lstm_tagger_kernel(%arg0: memref<8xi32, #tpu.memory_space<smem>>, %arg1: memref<16x32xf32, #tpu.memory_space<vmem>>, %arg2: memref<5x32x128xf32, #tpu.memory_space<vmem>>, %arg3: memref<5x128xf32, #tpu.memory_space<vmem>>, %arg4: memref<8x128xf32, #tpu.memory_space<vmem>>, %arg5: memref<8x32xf32, #tpu.memory_space<vmem>>) attributes {dimension_semantics = [], scalar_prefetch = 0 : i64, scratch_operands = 1 : i64, tpu.core_type = #tpu.core_type<tc>} {
    %c0 = arith.constant 0 : index
    %0 = memref.load %arg0[%c0] : memref<8xi32, #tpu.memory_space<smem>>
    %1 = arith.index_cast %0 : i32 to index
    %c0_0 = arith.constant 0 : index
    %2 = vector.load %arg1[%1, %c0_0] : memref<16x32xf32, #tpu.memory_space<vmem>>, vector<1x32xf32>
    %c0_1 = arith.constant 0 : index
    %c0_2 = arith.constant 0 : index
    %3 = vector.load %arg5[%c0_1, %c0_2] : memref<8x32xf32, #tpu.memory_space<vmem>>, vector<1x32xf32>
    tpu.vector_store %arg5[%c0_1, %c0_2], %2 {strides = array<i32>} : memref<8x32xf32, #tpu.memory_space<vmem>>, vector<1x32xf32>,
    %c1 = arith.constant 1 : index
    %4 = memref.load %arg0[%c1] : memref<8xi32, #tpu.memory_space<smem>>
    %5 = arith.index_cast %4 : i32 to index
    %c0_3 = arith.constant 0 : index
    %6 = vector.load %arg1[%5, %c0_3] : memref<16x32xf32, #tpu.memory_space<vmem>>, vector<1x32xf32>
    %c1_4 = arith.constant 1 : index
    %c0_5 = arith.constant 0 : index
    %7 = vector.load %arg5[%c1_4, %c0_5] : memref<8x32xf32, #tpu.memory_space<vmem>>, vector<1x32xf32>
    tpu.vector_store %arg5[%c1_4, %c0_5], %6 {strides = array<i32>} : memref<8x32xf32, #tpu.memory_space<vmem>>, vector<1x32xf32>,
    %c2 = arith.constant 2 : index
    %8 = memref.load %arg0[%c2] : memref<8xi32, #tpu.memory_space<smem>>
    %9 = arith.index_cast %8 : i32 to index
    %c0_6 = arith.constant 0 : index
    %10 = vector.load %arg1[%9, %c0_6] : memref<16x32xf32, #tpu.memory_space<vmem>>, vector<1x32xf32>
    %c2_7 = arith.constant 2 : index
    %c0_8 = arith.constant 0 : index
    %11 = vector.load %arg5[%c2_7, %c0_8] : memref<8x32xf32, #tpu.memory_space<vmem>>, vector<1x32xf32>
    tpu.vector_store %arg5[%c2_7, %c0_8], %10 {strides = array<i32>} : memref<8x32xf32, #tpu.memory_space<vmem>>, vector<1x32xf32>,
    %c3 = arith.constant 3 : index
    %12 = memref.load %arg0[%c3] : memref<8xi32, #tpu.memory_space<smem>>
    %13 = arith.index_cast %12 : i32 to index
    %c0_9 = arith.constant 0 : index
    %14 = vector.load %arg1[%13, %c0_9] : memref<16x32xf32, #tpu.memory_space<vmem>>, vector<1x32xf32>
    %c3_10 = arith.constant 3 : index
    %c0_11 = arith.constant 0 : index
    %15 = vector.load %arg5[%c3_10, %c0_11] : memref<8x32xf32, #tpu.memory_space<vmem>>, vector<1x32xf32>
    tpu.vector_store %arg5[%c3_10, %c0_11], %14 {strides = array<i32>} : memref<8x32xf32, #tpu.memory_space<vmem>>, vector<1x32xf32>,
    %c4 = arith.constant 4 : index
    %16 = memref.load %arg0[%c4] : memref<8xi32, #tpu.memory_space<smem>>
    %17 = arith.index_cast %16 : i32 to index
    %c0_12 = arith.constant 0 : index
    %18 = vector.load %arg1[%17, %c0_12] : memref<16x32xf32, #tpu.memory_space<vmem>>, vector<1x32xf32>
    %c4_13 = arith.constant 4 : index
    %c0_14 = arith.constant 0 : index
    %19 = vector.load %arg5[%c4_13, %c0_14] : memref<8x32xf32, #tpu.memory_space<vmem>>, vector<1x32xf32>
    tpu.vector_store %arg5[%c4_13, %c0_14], %18 {strides = array<i32>} : memref<8x32xf32, #tpu.memory_space<vmem>>, vector<1x32xf32>,
    %c5 = arith.constant 5 : index
    %20 = memref.load %arg0[%c5] : memref<8xi32, #tpu.memory_space<smem>>
    %21 = arith.index_cast %20 : i32 to index
    %c0_15 = arith.constant 0 : index
    %22 = vector.load %arg1[%21, %c0_15] : memref<16x32xf32, #tpu.memory_space<vmem>>, vector<1x32xf32>
    %c5_16 = arith.constant 5 : index
    %c0_17 = arith.constant 0 : index
    %23 = vector.load %arg5[%c5_16, %c0_17] : memref<8x32xf32, #tpu.memory_space<vmem>>, vector<1x32xf32>
    tpu.vector_store %arg5[%c5_16, %c0_17], %22 {strides = array<i32>} : memref<8x32xf32, #tpu.memory_space<vmem>>, vector<1x32xf32>,
    %c6 = arith.constant 6 : index
    %24 = memref.load %arg0[%c6] : memref<8xi32, #tpu.memory_space<smem>>
    %25 = arith.index_cast %24 : i32 to index
    %c0_18 = arith.constant 0 : index
    %26 = vector.load %arg1[%25, %c0_18] : memref<16x32xf32, #tpu.memory_space<vmem>>, vector<1x32xf32>
    %c6_19 = arith.constant 6 : index
    %c0_20 = arith.constant 0 : index
    %27 = vector.load %arg5[%c6_19, %c0_20] : memref<8x32xf32, #tpu.memory_space<vmem>>, vector<1x32xf32>
    tpu.vector_store %arg5[%c6_19, %c0_20], %26 {strides = array<i32>} : memref<8x32xf32, #tpu.memory_space<vmem>>, vector<1x32xf32>,
    %c7 = arith.constant 7 : index
    %28 = memref.load %arg0[%c7] : memref<8xi32, #tpu.memory_space<smem>>
    %29 = arith.index_cast %28 : i32 to index
    %c0_21 = arith.constant 0 : index
    %30 = vector.load %arg1[%29, %c0_21] : memref<16x32xf32, #tpu.memory_space<vmem>>, vector<1x32xf32>
    %c7_22 = arith.constant 7 : index
    %c0_23 = arith.constant 0 : index
    %31 = vector.load %arg5[%c7_22, %c0_23] : memref<8x32xf32, #tpu.memory_space<vmem>>, vector<1x32xf32>
    tpu.vector_store %arg5[%c7_22, %c0_23], %30 {strides = array<i32>} : memref<8x32xf32, #tpu.memory_space<vmem>>, vector<1x32xf32>,
    %c0_24 = arith.constant 0 : index
    %c0_25 = arith.constant 0 : index
    %32 = vector.load %arg3[%c0_24, %c0_25] : memref<5x128xf32, #tpu.memory_space<vmem>>, vector<5x128xf32>
    %c0_26 = arith.constant 0 : index
    %c0_27 = arith.constant 0 : index
    %33 = vector.load %arg5[%c0_26, %c0_27] : memref<8x32xf32, #tpu.memory_space<vmem>>, vector<8x32xf32>
    %c0_28 = arith.constant 0 : index
    %c0_29 = arith.constant 0 : index
    %c0_30 = arith.constant 0 : index
    %34 = vector.load %arg2[%c0_28, %c0_29, %c0_30] : memref<5x32x128xf32, #tpu.memory_space<vmem>>, vector<1x32x128xf32>
    %35 = vector.shape_cast %34 : vector<1x32x128xf32> to vector<32x128xf32>
    %cst = arith.constant dense<0.000000e+00> : vector<8x128xf32>
    %36 = tpu.matmul %33, %35, %cst {dimension_numbers = #tpu.dot_dimension_numbers<[1], [0], [0], [1], [0, 0, 1, 1], [], []>} : vector<8x32xf32>, vector<32x128xf32>, vector<8x128xf32> -> vector<8x128xf32>
    %37 = vector.extract_strided_slice %32 {offsets = [0, 0], sizes = [1, 128], strides = [1, 1]} : vector<5x128xf32> to vector<1x128xf32>
    %38 = vector.broadcast %37 : vector<1x128xf32> to vector<8x128xf32>
    %39 = arith.addf %36, %38 : vector<8x128xf32>
    %40 = vector.extract_strided_slice %39 {offsets = [0, 0], sizes = [8, 32], strides = [1, 1]} : vector<8x128xf32> to vector<8x32xf32>
    %41 = arith.negf %40 : vector<8x32xf32>
    %42 = math.exp %41 : vector<8x32xf32>
    %cst_31 = arith.constant 1.000000e+00 : f32
    %43 = vector.broadcast %cst_31 : f32 to vector<8x32xf32>
    %44 = arith.addf %43, %42 : vector<8x32xf32>
    %45 = arith.divf %43, %44 : vector<8x32xf32>
    %46 = vector.extract_strided_slice %39 {offsets = [0, 32], sizes = [8, 32], strides = [1, 1]} : vector<8x128xf32> to vector<8x32xf32>
    %47 = math.tanh %46 : vector<8x32xf32>
    %48 = vector.extract_strided_slice %39 {offsets = [0, 64], sizes = [8, 32], strides = [1, 1]} : vector<8x128xf32> to vector<8x32xf32>
    %49 = arith.negf %48 : vector<8x32xf32>
    %50 = math.exp %49 : vector<8x32xf32>
    %cst_32 = arith.constant 1.000000e+00 : f32
    %51 = vector.broadcast %cst_32 : f32 to vector<8x32xf32>
    %52 = arith.addf %51, %50 : vector<8x32xf32>
    %53 = arith.divf %51, %52 : vector<8x32xf32>
    %54 = arith.mulf %45, %47 : vector<8x32xf32>
    %55 = math.tanh %54 : vector<8x32xf32>
    %56 = arith.mulf %53, %55 : vector<8x32xf32>
    %c1_33 = arith.constant 1 : index
    %c0_34 = arith.constant 0 : index
    %c0_35 = arith.constant 0 : index
    %57 = vector.load %arg2[%c1_33, %c0_34, %c0_35] : memref<5x32x128xf32, #tpu.memory_space<vmem>>, vector<1x32x128xf32>
    %58 = vector.shape_cast %57 : vector<1x32x128xf32> to vector<32x128xf32>
    %cst_36 = arith.constant dense<0.000000e+00> : vector<8x128xf32>
    %59 = tpu.matmul %56, %58, %cst_36 {dimension_numbers = #tpu.dot_dimension_numbers<[1], [0], [0], [1], [0, 0, 1, 1], [], []>} : vector<8x32xf32>, vector<32x128xf32>, vector<8x128xf32> -> vector<8x128xf32>
    %60 = vector.extract_strided_slice %32 {offsets = [1, 0], sizes = [1, 128], strides = [1, 1]} : vector<5x128xf32> to vector<1x128xf32>
    %61 = vector.broadcast %60 : vector<1x128xf32> to vector<8x128xf32>
    %62 = arith.addf %59, %61 : vector<8x128xf32>
    %63 = vector.extract_strided_slice %62 {offsets = [0, 0], sizes = [8, 32], strides = [1, 1]} : vector<8x128xf32> to vector<8x32xf32>
    %64 = arith.negf %63 : vector<8x32xf32>
    %65 = math.exp %64 : vector<8x32xf32>
    %cst_37 = arith.constant 1.000000e+00 : f32
    %66 = vector.broadcast %cst_37 : f32 to vector<8x32xf32>
    %67 = arith.addf %66, %65 : vector<8x32xf32>
    %68 = arith.divf %66, %67 : vector<8x32xf32>
    %69 = vector.extract_strided_slice %62 {offsets = [0, 32], sizes = [8, 32], strides = [1, 1]} : vector<8x128xf32> to vector<8x32xf32>
    %70 = math.tanh %69 : vector<8x32xf32>
    %71 = vector.extract_strided_slice %62 {offsets = [0, 64], sizes = [8, 32], strides = [1, 1]} : vector<8x128xf32> to vector<8x32xf32>
    %72 = arith.negf %71 : vector<8x32xf32>
    %73 = math.exp %72 : vector<8x32xf32>
    %cst_38 = arith.constant 1.000000e+00 : f32
    %74 = vector.broadcast %cst_38 : f32 to vector<8x32xf32>
    %75 = arith.addf %74, %73 : vector<8x32xf32>
    %76 = arith.divf %74, %75 : vector<8x32xf32>
    %77 = arith.mulf %68, %70 : vector<8x32xf32>
    %78 = math.tanh %77 : vector<8x32xf32>
    %79 = arith.mulf %76, %78 : vector<8x32xf32>
    %c2_39 = arith.constant 2 : index
    %c0_40 = arith.constant 0 : index
    %c0_41 = arith.constant 0 : index
    %80 = vector.load %arg2[%c2_39, %c0_40, %c0_41] : memref<5x32x128xf32, #tpu.memory_space<vmem>>, vector<1x32x128xf32>
    %81 = vector.shape_cast %80 : vector<1x32x128xf32> to vector<32x128xf32>
    %cst_42 = arith.constant dense<0.000000e+00> : vector<8x128xf32>
    %82 = tpu.matmul %79, %81, %cst_42 {dimension_numbers = #tpu.dot_dimension_numbers<[1], [0], [0], [1], [0, 0, 1, 1], [], []>} : vector<8x32xf32>, vector<32x128xf32>, vector<8x128xf32> -> vector<8x128xf32>
    %83 = vector.extract_strided_slice %32 {offsets = [2, 0], sizes = [1, 128], strides = [1, 1]} : vector<5x128xf32> to vector<1x128xf32>
    %84 = vector.broadcast %83 : vector<1x128xf32> to vector<8x128xf32>
    %85 = arith.addf %82, %84 : vector<8x128xf32>
    %86 = vector.extract_strided_slice %85 {offsets = [0, 0], sizes = [8, 32], strides = [1, 1]} : vector<8x128xf32> to vector<8x32xf32>
    %87 = arith.negf %86 : vector<8x32xf32>
    %88 = math.exp %87 : vector<8x32xf32>
    %cst_43 = arith.constant 1.000000e+00 : f32
    %89 = vector.broadcast %cst_43 : f32 to vector<8x32xf32>
    %90 = arith.addf %89, %88 : vector<8x32xf32>
    %91 = arith.divf %89, %90 : vector<8x32xf32>
    %92 = vector.extract_strided_slice %85 {offsets = [0, 32], sizes = [8, 32], strides = [1, 1]} : vector<8x128xf32> to vector<8x32xf32>
    %93 = math.tanh %92 : vector<8x32xf32>
    %94 = vector.extract_strided_slice %85 {offsets = [0, 64], sizes = [8, 32], strides = [1, 1]} : vector<8x128xf32> to vector<8x32xf32>
    %95 = arith.negf %94 : vector<8x32xf32>
    %96 = math.exp %95 : vector<8x32xf32>
    %cst_44 = arith.constant 1.000000e+00 : f32
    %97 = vector.broadcast %cst_44 : f32 to vector<8x32xf32>
    %98 = arith.addf %97, %96 : vector<8x32xf32>
    %99 = arith.divf %97, %98 : vector<8x32xf32>
    %100 = arith.mulf %91, %93 : vector<8x32xf32>
    %101 = math.tanh %100 : vector<8x32xf32>
    %102 = arith.mulf %99, %101 : vector<8x32xf32>
    %c3_45 = arith.constant 3 : index
    %c0_46 = arith.constant 0 : index
    %c0_47 = arith.constant 0 : index
    %103 = vector.load %arg2[%c3_45, %c0_46, %c0_47] : memref<5x32x128xf32, #tpu.memory_space<vmem>>, vector<1x32x128xf32>
    %104 = vector.shape_cast %103 : vector<1x32x128xf32> to vector<32x128xf32>
    %cst_48 = arith.constant dense<0.000000e+00> : vector<8x128xf32>
    %105 = tpu.matmul %102, %104, %cst_48 {dimension_numbers = #tpu.dot_dimension_numbers<[1], [0], [0], [1], [0, 0, 1, 1], [], []>} : vector<8x32xf32>, vector<32x128xf32>, vector<8x128xf32> -> vector<8x128xf32>
    %106 = vector.extract_strided_slice %32 {offsets = [3, 0], sizes = [1, 128], strides = [1, 1]} : vector<5x128xf32> to vector<1x128xf32>
    %107 = vector.broadcast %106 : vector<1x128xf32> to vector<8x128xf32>
    %108 = arith.addf %105, %107 : vector<8x128xf32>
    %109 = vector.extract_strided_slice %108 {offsets = [0, 0], sizes = [8, 32], strides = [1, 1]} : vector<8x128xf32> to vector<8x32xf32>
    %110 = arith.negf %109 : vector<8x32xf32>
    %111 = math.exp %110 : vector<8x32xf32>
    %cst_49 = arith.constant 1.000000e+00 : f32
    %112 = vector.broadcast %cst_49 : f32 to vector<8x32xf32>
    %113 = arith.addf %112, %111 : vector<8x32xf32>
    %114 = arith.divf %112, %113 : vector<8x32xf32>
    %115 = vector.extract_strided_slice %108 {offsets = [0, 32], sizes = [8, 32], strides = [1, 1]} : vector<8x128xf32> to vector<8x32xf32>
    %116 = math.tanh %115 : vector<8x32xf32>
    %117 = vector.extract_strided_slice %108 {offsets = [0, 64], sizes = [8, 32], strides = [1, 1]} : vector<8x128xf32> to vector<8x32xf32>
    %118 = arith.negf %117 : vector<8x32xf32>
    %119 = math.exp %118 : vector<8x32xf32>
    %cst_50 = arith.constant 1.000000e+00 : f32
    %120 = vector.broadcast %cst_50 : f32 to vector<8x32xf32>
    %121 = arith.addf %120, %119 : vector<8x32xf32>
    %122 = arith.divf %120, %121 : vector<8x32xf32>
    %123 = arith.mulf %114, %116 : vector<8x32xf32>
    %124 = math.tanh %123 : vector<8x32xf32>
    %125 = arith.mulf %122, %124 : vector<8x32xf32>
    %c4_51 = arith.constant 4 : index
    %c0_52 = arith.constant 0 : index
    %c0_53 = arith.constant 0 : index
    %126 = vector.load %arg2[%c4_51, %c0_52, %c0_53] : memref<5x32x128xf32, #tpu.memory_space<vmem>>, vector<1x32x128xf32>
    %127 = vector.shape_cast %126 : vector<1x32x128xf32> to vector<32x128xf32>
    %cst_54 = arith.constant dense<0.000000e+00> : vector<8x128xf32>
    %128 = tpu.matmul %125, %127, %cst_54 {dimension_numbers = #tpu.dot_dimension_numbers<[1], [0], [0], [1], [0, 0, 1, 1], [], []>} : vector<8x32xf32>, vector<32x128xf32>, vector<8x128xf32> -> vector<8x128xf32>
    %129 = vector.extract_strided_slice %32 {offsets = [4, 0], sizes = [1, 128], strides = [1, 1]} : vector<5x128xf32> to vector<1x128xf32>
    %130 = vector.broadcast %129 : vector<1x128xf32> to vector<8x128xf32>
    %131 = arith.addf %128, %130 : vector<8x128xf32>
    %cst_55 = arith.constant dense<0xFF800000> : vector<8xf32>
    %132 = vector.multi_reduction <maximumf>, %131, %cst_55 [1] : vector<8x128xf32> to vector<8xf32>
    %133 = vector.shape_cast %132 : vector<8xf32> to vector<8x1xf32>
    %134 = vector.broadcast %133 : vector<8x1xf32> to vector<8x128xf32>
    %135 = arith.subf %131, %134 : vector<8x128xf32>
    %136 = math.exp %135 : vector<8x128xf32>
    %cst_56 = arith.constant dense<0.000000e+00> : vector<8xf32>
    %137 = vector.multi_reduction <add>, %136, %cst_56 [1] : vector<8x128xf32> to vector<8xf32>
    %138 = vector.shape_cast %137 : vector<8xf32> to vector<8x1xf32>
    %139 = math.log %138 : vector<8x1xf32>
    %140 = vector.broadcast %139 : vector<8x1xf32> to vector<8x128xf32>
    %141 = arith.subf %135, %140 : vector<8x128xf32>
    %c0_57 = arith.constant 0 : index
    %c0_58 = arith.constant 0 : index
    %142 = vector.load %arg4[%c0_57, %c0_58] : memref<8x128xf32, #tpu.memory_space<vmem>>, vector<8x128xf32>
    tpu.vector_store %arg4[%c0_57, %c0_58], %141 {strides = array<i32>} : memref<8x128xf32, #tpu.memory_space<vmem>>, vector<8x128xf32>,
    return
  }
}

</mosaic_0001>

<bundles_post_ra>
// kernel: tpu_custom_call.1
= control target key start
LH: loop header
LB: loop body
LE: loop exit
PB: predicated region body
PF: predicated region fallthrough
CT: control target
= control target key end

     0   :  { %9 = vsyncpa [#allocation6], 0  ;;  %s1021_s0 = inlined_call_operand.hbm [shape: s32[8], index: 0, kind: input, shape index: {}]   ;;  %s1022_s1 = inlined_call_operand.hbm [shape: f32[16,32], index: 1, kind: input, shape index: {}]   ;;  %s1023_s2 = inlined_call_operand.hbm [shape: f32[5,32,128], index: 2, kind: input, shape index: {}]   ;;  %s1024_s3 = inlined_call_operand.vmem [shape: f32[5,128], index: 3, kind: input, shape index: {}]   ;;  %s1025_s4 = inlined_call_operand.hbm [shape: f32[8,128], index: 4, kind: output, shape index: {}]  }
   0x1   :  { %10 = vsyncpa [#allocation4], 0 }
   0x2   :  { %11 = vsyncpa [#allocation9], 0 }
   0x3   :  { %12 = vsyncpa [#allocation5], 0  ;;  %s791_s17 = scalar_lea.hbm %s1021_s0, 16 }
   0x4   :  { %p792_p0 = scmp.ne.s32.totalorder %s1021_s0, %s791_s17  ;;  %p795_p1 = scmp.lt.u32.totalorder %s791_s17, %s1021_s0 }
   0x6   :  { %p797_p2 = pnand %p795_p1, %p792_p0 }
   0x8   :  { %800 = shalt.err (!%p797_p2)
}
   0x9   :  { %s875_s22 = smov [#allocation3]   ;;  %s876_s25 = smov [#allocation7]  }
   0xa   :  { %20 = dma.hbm_to_smem %s1021_s0, 16, %s875_s22, [#allocation6]  }
   0xb   :  { %s26_s26 = sshll.u32 %s876_s25, 4  ;;  %s801_s29 = scalar_lea.hbm %s1022_s1, 256  ;;  %s27_s26 = int_to_ptr.vmem [resolvable:$true] %s26_s26 }
   0xc   :  { %p802_p3 = scmp.ne.s32.totalorder %s1022_s1, %s801_s29  ;;  %p805_p4 = scmp.lt.u32.totalorder %s801_s29, %s1022_s1 }
   0xe   :  { %p807_p5 = pnand %p805_p4, %p802_p3 }
  0x10   :  { %810 = shalt.err (!%p807_p5)
}
  0x11   :  { %s811_s8 = scalar_lea.vmem %s27_s26, 256  ;;  %p816_p7 = scmp.lt.s32.totalorder %s27_s26, %s27_s26 }
  0x12   :  { %p812_p6 = scmp.ne.s32.totalorder %s27_s26, %s811_s8  ;;  %p817_p8 = scmp.lt.s32.totalorder %s811_s8, %s811_s8 }
  0x14   :  { %p818_p9 = por %p817_p8, %p816_p7 }
  0x16   :  { %p819_p10 = pnand %p818_p9, %p812_p6 }
  0x18   :  { %822 = shalt.err (!%p819_p10)
}
  0x19   :  { %s877_s0 = smov 128   ;;  %s878_s9 = smov 8  }
  0x1a   :  { %32 = dma.hbm_to_vmem [thread:$0]  %s1022_s1, 256, %s27_s26, [#allocation4], %s877_s0, %s877_s0, %s878_s9  }
  0x1b   :  { %s879_s12 = smov [#allocation8]   ;;  %s823_s16 = scalar_lea.hbm %s1023_s2, 2560 }
  0x1c   :  { %s38_s13 = sshll.u32 %s879_s12, 4  ;;  %p824_p11 = scmp.ne.s32.totalorder %s1023_s2, %s823_s16  ;;  %s39_s13 = int_to_ptr.vmem [resolvable:$true] %s38_s13 }
  0x1d   :  { %p827_p12 = scmp.lt.u32.totalorder %s823_s16, %s1023_s2 }
  0x1f   :  { %p829_p13 = pnand %p827_p12, %p824_p11 }
  0x21   :  { %832 = shalt.err (!%p829_p13)
}
  0x22   :  { %s833_s21 = scalar_lea.vmem %s39_s13, 2560  ;;  %p838_p1 = scmp.lt.s32.totalorder %s39_s13, %s39_s13 }
  0x23   :  { %p834_p0 = scmp.ne.s32.totalorder %s39_s13, %s833_s21  ;;  %p839_p2 = scmp.lt.s32.totalorder %s833_s21, %s833_s21 }
  0x25   :  { %p840_p3 = por %p839_p2, %p838_p1 }
  0x27   :  { %p841_p4 = pnand %p840_p3, %p834_p0 }
  0x29   :  { %844 = shalt.err (!%p841_p4)
}
  0x2a   :  { %44 = dma.hbm_to_vmem [thread:$0]  %s1023_s2, 2560, %s39_s13, [#allocation9], %s877_s0, %s877_s0, %s878_s9  }
  0x2b   :  { %867 = dma.done.wait [#allocation6], 16  }
  0x2c   :  { %868 = vsyncadd [#allocation6], 4294967280 }
  0x2d   :  { %869 = dma.done.wait [#allocation4], 256  }
  0x2e   :  { %870 = vsyncadd [#allocation4], 4294967040 }
  0x2f   :  { %871 = dma.done.wait [#allocation9], 2560  }
  0x30   :  { %872 = vsyncadd [#allocation9], 4294964736 }
  0x31   :  { %56 = sfence }
  0x32   :  { %v92_v0 = vld [vmem:[#allocation8] sm:$0xff]  ;;  %v93_v1 = vld [vmem:[#allocation8 + $0x8] sm:$0xff]  ;;  %v94_v2 = vld [vmem:[#allocation8 + $0x10] sm:$0xff]  ;;  %v880_v3 = vmov 0.0|0.0   ;;  %vm881_vm0 = vmmov 0   ;;  %v882_v6 = vmov 0.0   ;;  %v96_v17 = vlaneseq }
  0x33   :  { %714 = vmatprep.subr.bf16.mxu0 %v880_v3  ;;  %v715_v4 = vpack.c.bf16 %v93_v1, %v92_v0  ;;  %v95_v5 = vld [vmem:[#allocation8 + $0x18] sm:$0xff]  ;;  %667 = vmatprep.mubr.msk.f32.mxu0 %vm881_vm0, %v882_v6  ;;  %s57_s2 = sld [smem:[#allocation3]]  ;;  %s618_s23 = sld [smem:[#allocation3 + $0x1]]  ;;  %vm60_vm1 = vcmask 253952   ;;  %vm100_vm2 = vcmask 261120   ;;  %v193_v32 = vld [vmem:[#allocation8 + $0x20] sm:$0xff] }
  0x34   :  { %s619_s24 = sld [smem:[#allocation3 + $0x2]]  ;;  %s620_s25 = sld [smem:[#allocation3 + $0x3]]  ;;  %720 = vmatprep.subr.bf16.mxu1 %v880_v3  ;;  %678 = vmatprep.mubr.msk.f32.mxu1 %vm881_vm0, %v882_v6  ;;  %v718_v7 = vpack.c.bf16 %v95_v5, %v94_v2  ;;  %v966_v18 = vshrl.u32 %v96_v17, 7  ;;  %v972_v20 = vld [vmem:[%s1024_s3] sm:$0x1f]  ;;  %v194_v33 = vld [vmem:[#allocation8 + $0x28] sm:$0xff] }
  0x35   :  { %716 = vmatpush3.bf16.msra.mxu0 %v715_v4  ;;  %s621_s26 = sld [smem:[#allocation3 + $0x4]]  ;;  %s622_s27 = sld [smem:[#allocation3 + $0x5]]  ;;  %v195_v34 = vld [vmem:[#allocation8 + $0x30] sm:$0xff]  ;;  %v721_v35 = vpack.c.bf16 %v194_v33, %v193_v32  ;;  %v196_v36 = vld [vmem:[#allocation8 + $0x38] sm:$0xff]  ;;  %v295_v54 = vld [vmem:[#allocation8 + $0x40] sm:$0xff] }
  0x36   :  { %717 = vmatprep.subr.bf16.mxu0 %v880_v3  ;;  %s623_s28 = sld [smem:[#allocation3 + $0x6]]  ;;  %s624_s29 = sld [smem:[#allocation3 + $0x7]]  ;;  %v98_v19 = vsub.s32 0, %v966_v18  ;;  %v724_v37 = vpack.c.bf16 %v196_v36, %v195_v34  ;;  %v199_v42 = vsub.s32 1, %v966_v18  ;;  %v296_v55 = vld [vmem:[#allocation8 + $0x48] sm:$0xff]  ;;  %v297_v56 = vld [vmem:[#allocation8 + $0x50] sm:$0xff] }
  0x37   :  { %s883_s13 = smov 96   ;;  %722 = vmatpush3.bf16.msra.mxu1 %v721_v35  ;;  %s884_s3 = smov 64   ;;  %v727_v57 = vpack.c.bf16 %v296_v55, %v295_v54  ;;  %v298_v58 = vld [vmem:[#allocation8 + $0x58] sm:$0xff]  ;;  %v301_v0 = vsub.s32 2, %v966_v18 }
  0x38   :  { %v99_v21 = vrot.slane %v972_v20, %v98_v19  ;;  %723 = vmatprep.subr.bf16.mxu1 %v880_v3  ;;  %v200_v43 = vrot.slane %v972_v20, %v199_v42  ;;  %v730_v59 = vpack.c.bf16 %v298_v58, %v297_v56  ;;  %v400_v17 = vld [vmem:[#allocation8 + $0x78] sm:$0xff]  ;;  %s885_s14 = smov [#allocation10]  }
  0x39   :  { %719 = vmatpush3.bf16.msra.mxu0 %v718_v7  ;;  %s58_s30 = scalar_lea.vmem [#allocation7], %s57_s2  ;;  %s63_s5 = scalar_lea.vmem [#allocation7], %s618_s23  ;;  %v302_v1 = vrot.slane %v972_v20, %v301_v0 }
  0x3a   :  { %v59_v8 = vld [vmem:[%s58_s30] sm:$0x1]  ;;  %726 = vmatprep.subr.bf16.mxu0 %v880_v3  ;;  %s67_s6 = scalar_lea.vmem [#allocation7], %s619_s24  ;;  %s71_s7 = scalar_lea.vmem [#allocation7], %s620_s25 }
  0x3b   :  { %v64_v9 = vld [vmem:[%s63_s5] sm:$0x1]  ;;  %61 = vst.msk [vmem:[#allocation2] sm:$0x1] %vm60_vm1, %v59_v8  ;;  %s75_s8 = scalar_lea.vmem [#allocation7], %s621_s26  ;;  %s79_s0 = scalar_lea.vmem [#allocation7], %s622_s27  ;;  %725 = vmatpush3.bf16.msra.mxu1 %v724_v37 }
  0x3c   :  { %65 = vst.msk [vmem:[#allocation2 + $0x1] sm:$0x1] %vm60_vm1, %v64_v9  ;;  %v68_v10 = vld [vmem:[%s67_s6] sm:$0x1]  ;;  %s83_s9 = scalar_lea.vmem [#allocation7], %s623_s28  ;;  %s87_s10 = scalar_lea.vmem [#allocation7], %s624_s29  ;;  %732 = vmatprep.subr.bf16.mxu1 %v880_v3 }
  0x3d   :  { %v72_v11 = vld [vmem:[%s71_s7] sm:$0x1]  ;;  %69 = vst.msk [vmem:[#allocation2 + $0x2] sm:$0x1] %vm60_vm1, %v68_v10  ;;  %s599_s15 = sshll.u32 %s885_s14, 4  ;;  %s600_s15 = int_to_ptr.vmem [resolvable:$true] %s599_s15 }
  0x3e   :  { %73 = vst.msk [vmem:[#allocation2 + $0x3] sm:$0x1] %vm60_vm1, %v72_v11  ;;  %v76_v12 = vld [vmem:[%s75_s8] sm:$0x1]  ;;  %s845_s16 = scalar_lea.vmem %s600_s15, 128  ;;  %p850_p6 = scmp.lt.s32.totalorder %s600_s15, %s600_s15 }
  0x3f   :  { %v80_v13 = vld [vmem:[%s79_s0] sm:$0x1]  ;;  %77 = vst.msk [vmem:[#allocation2 + $0x4] sm:$0x1] %vm60_vm1, %v76_v12  ;;  %p846_p5 = scmp.ne.s32.totalorder %s600_s15, %s845_s16  ;;  %p851_p7 = scmp.lt.s32.totalorder %s845_s16, %s845_s16 }
  0x40   :  { %81 = vst.msk [vmem:[#allocation2 + $0x5] sm:$0x1] %vm60_vm1, %v80_v13  ;;  %v84_v14 = vld [vmem:[%s83_s9] sm:$0x1] }
  0x41   :  { %v88_v15 = vld [vmem:[%s87_s10] sm:$0x1]  ;;  %85 = vst.msk [vmem:[#allocation2 + $0x6] sm:$0x1] %vm60_vm1, %v84_v14  ;;  %v398_v14 = vld [vmem:[#allocation8 + $0x68] sm:$0xff]  ;;  %p852_p8 = por %p851_p7, %p850_p6 }
  0x42   :  { %89 = vst.msk [vmem:[#allocation2 + $0x7] sm:$0x1] %vm60_vm1, %v88_v15  ;;  %v399_v15 = vld [vmem:[#allocation8 + $0x70] sm:$0xff]  ;;  %v499_v37 = vld [vmem:[#allocation8 + $0x80] sm:$0xff] }
  0x43   :  { %v736_v19 = vpack.c.bf16 %v400_v17, %v399_v15  ;;  %p853_p9 = pnand %p852_p8, %p846_p5 }
  0x49   :  { %v91_v16 = vld [vmem:[#allocation2] sm:$0xff] }
  0x4a   :  { %668 = vmatmul.mubr.msk.f32.vlgmr.msra.gmra.mrb[0].mxu0 %vm100_vm2, %v91_v16 }
  0x4b   :  { %689 = vmatprep.mubr.msk.f32.mxu0 %vm881_vm0, %v882_v6  ;;  %728 = vmatpush3.bf16.msra.mxu0 %v727_v57 }
  0x4c   :  { %729 = vmatprep.subr.bf16.mxu0 %v880_v3 }
  0x4f   :  { %731 = vmatpush3.bf16.msra.mxu0 %v730_v59 }
  0x50   :  { %738 = vmatprep.subr.bf16.mxu0 %v880_v3 }
 0x11d   :  { %v170_v22 = vpop.f32.mrb[0].mxu0 }
 0x11e   :  { %v171_v23 = vadd.f32 %v170_v22, %v99_v21  ;;  %v669_v24 = vpop.f32.mrb[1].mxu0 }
 0x120   :  { %755 = vtanh.f32 %v171_v23  ;;  %v626_v26 = vmul.f32 -1.442695, %v171_v23 }
 0x122   :  { %757 = vpow2.f32 %v626_v26 }
 0x12a   :  { %v756_v25 = vpop.eup %755 }
 0x12b   :  { %182 = vrot.lane.b32.xlu0 %v756_v25, %s883_s13  ;;  %v403_v25 = vsub.s32 3, %v966_v18 }
 0x12c   :  { %v758_v27 = vpop.eup %757 }
 0x12d   :  { %v177_v28 = vadd.f32 1.0, %v758_v27  ;;  %v404_v26 = vrot.slane %v972_v20, %v403_v25 }
 0x12f   :  { %759 = vrcp.f32 %v177_v28 }
 0x139   :  { %v760_v29 = vpop.eup %759 }
 0x19d   :  { %v183_v30 = vpop.permute.xlu0 %182 }
 0x19e   :  { %v185_v31 = vmul.f32 %v760_v29, %v183_v30 }
 0x1a0   :  { %761 = vtanh.f32 %v185_v31 }
 0x1aa   :  { %v762_v38 = vpop.eup %761 }
 0x1ab   :  { %188 = vrot.lane.b32.xlu0 %v762_v38, %s884_s3  ;;  %v500_v38 = vld [vmem:[#allocation8 + $0x88] sm:$0xff] }
 0x21d   :  { %v189_v39 = vpop.permute.xlu0 %188 }
 0x21e   :  { %v191_v40 = vmul.f32 %v760_v29, %v189_v39  ;;  %v501_v39 = vld [vmem:[#allocation8 + $0x90] sm:$0xff] }
 0x220   :  { %202 = vrot.lane.b32.xlu1 %v191_v40, %s884_s3  ;;  %v739_v40 = vpack.c.bf16 %v500_v38, %v499_v37 }
 0x292   :  { %v203_v41 = vpop.permute.xlu1 %202 }
 0x293   :  { %679 = vmatmul.mubr.msk.f32.vlgmr.msra.gmra.mrb[0].mxu1 %vm100_vm2, %v203_v41  ;;  %v502_v41 = vld [vmem:[#allocation8 + $0x98] sm:$0xff] }
 0x294   :  { %700 = vmatprep.mubr.msk.f32.mxu1 %vm881_vm0, %v882_v6  ;;  %v742_v42 = vpack.c.bf16 %v502_v41, %v501_v39 }
 0x366   :  { %v272_v44 = vpop.f32.mrb[0].mxu1 }
 0x367   :  { %v273_v45 = vadd.f32 %v272_v44, %v200_v43  ;;  %v680_v46 = vpop.f32.mrb[1].mxu1 }
 0x369   :  { %763 = vtanh.f32 %v273_v45  ;;  %v628_v48 = vmul.f32 -1.442695, %v273_v45 }
 0x36b   :  { %765 = vpow2.f32 %v628_v48 }
 0x373   :  { %v764_v47 = vpop.eup %763 }
 0x374   :  { %284 = vrot.lane.b32.xlu1 %v764_v47, %s883_s13  ;;  %v505_v47 = vsub.s32 4, %v966_v18 }
 0x375   :  { %v766_v49 = vpop.eup %765 }
 0x376   :  { %v279_v50 = vadd.f32 1.0, %v766_v49  ;;  %v506_v48 = vrot.slane %v972_v20, %v505_v47 }
 0x378   :  { %767 = vrcp.f32 %v279_v50 }
 0x382   :  { %v768_v51 = vpop.eup %767 }
 0x3e6   :  { %v285_v52 = vpop.permute.xlu1 %284 }
 0x3e7   :  { %v287_v53 = vmul.f32 %v768_v51, %v285_v52 }
 0x3e9   :  { %769 = vtanh.f32 %v287_v53 }
 0x3f3   :  { %v770_v60 = vpop.eup %769 }
 0x3f4   :  { %290 = vrot.lane.b32.xlu0 %v770_v60, %s884_s3 }
 0x466   :  { %v291_v61 = vpop.permute.xlu0 %290 }
 0x467   :  { %v293_v62 = vmul.f32 %v768_v51, %v291_v61 }
 0x469   :  { %304 = vrot.lane.b32.xlu1 %v293_v62, %s884_s3 }
 0x4db   :  { %v305_v63 = vpop.permute.xlu1 %304 }
 0x4dc   :  { %690 = vmatmul.mubr.msk.f32.vlgmr.msra.gmra.mrb[2].mxu0 %vm100_vm2, %v305_v63 }
 0x4dd   :  { %711 = vmatprep.mubr.msk.f32.mxu0 %vm881_vm0, %v882_v6  ;;  %v397_v6 = vld [vmem:[#allocation8 + $0x60] sm:$0xff]  ;;  %740 = vmatpush3.bf16.msra.mxu0 %v739_v40 }
 0x4de   :  { %v733_v16 = vpack.c.bf16 %v398_v14, %v397_v6  ;;  %741 = vmatprep.subr.bf16.mxu0 %v880_v3 }
 0x4e0   :  { %734 = vmatpush3.bf16.msra.mxu1 %v733_v16 }
 0x4e1   :  { %735 = vmatprep.subr.bf16.mxu1 %v880_v3  ;;  %743 = vmatpush3.bf16.msra.mxu0 %v742_v42 }
 0x4e4   :  { %737 = vmatpush3.bf16.msra.mxu1 %v736_v19 }
 0x5af   :  { %v374_v2 = vpop.f32.mrb[2].mxu0 }
 0x5b0   :  { %v375_v4 = vadd.f32 %v374_v2, %v302_v1  ;;  %v691_v5 = vpop.f32.mrb[3].mxu0 }
 0x5b2   :  { %771 = vtanh.f32 %v375_v4  ;;  %v630_v8 = vmul.f32 -1.442695, %v375_v4 }
 0x5b4   :  { %773 = vpow2.f32 %v630_v8 }
 0x5bc   :  { %v772_v7 = vpop.eup %771 }
 0x5bd   :  { %386 = vrot.lane.b32.xlu0 %v772_v7, %s883_s13 }
 0x5be   :  { %v774_v9 = vpop.eup %773 }
 0x5bf   :  { %v381_v10 = vadd.f32 1.0, %v774_v9 }
 0x5c1   :  { %775 = vrcp.f32 %v381_v10 }
 0x5cb   :  { %v776_v11 = vpop.eup %775 }
 0x62f   :  { %v387_v12 = vpop.permute.xlu0 %386 }
 0x630   :  { %v389_v13 = vmul.f32 %v776_v11, %v387_v12 }
 0x632   :  { %777 = vtanh.f32 %v389_v13 }
 0x63c   :  { %v778_v21 = vpop.eup %777 }
 0x63d   :  { %392 = vrot.lane.b32.xlu1 %v778_v21, %s884_s3 }
 0x6af   :  { %v393_v22 = vpop.permute.xlu1 %392 }
 0x6b0   :  { %v395_v23 = vmul.f32 %v776_v11, %v393_v22 }
 0x6b2   :  { %406 = vrot.lane.b32.xlu0 %v395_v23, %s884_s3 }
 0x724   :  { %v407_v24 = vpop.permute.xlu0 %406 }
 0x725   :  { %701 = vmatmul.mubr.msk.f32.vlgmr.msra.gmra.mrb[2].mxu1 %vm100_vm2, %v407_v24 }
 0x7f8   :  { %v476_v27 = vpop.f32.mrb[2].mxu1 }
 0x7f9   :  { %v477_v28 = vadd.f32 %v476_v27, %v404_v26  ;;  %v702_v29 = vpop.f32.mrb[3].mxu1 }
 0x7fb   :  { %779 = vtanh.f32 %v477_v28  ;;  %v632_v31 = vmul.f32 -1.442695, %v477_v28 }
 0x7fd   :  { %781 = vpow2.f32 %v632_v31 }
 0x805   :  { %v780_v30 = vpop.eup %779 }
 0x806   :  { %488 = vrot.lane.b32.xlu1 %v780_v30, %s883_s13 }
 0x807   :  { %v782_v32 = vpop.eup %781 }
 0x808   :  { %v483_v33 = vadd.f32 1.0, %v782_v32 }
 0x80a   :  { %783 = vrcp.f32 %v483_v33 }
 0x814   :  { %v784_v34 = vpop.eup %783 }
 0x878   :  { %v489_v35 = vpop.permute.xlu1 %488 }
 0x879   :  { %v491_v36 = vmul.f32 %v784_v34, %v489_v35 }
 0x87b   :  { %785 = vtanh.f32 %v491_v36 }
 0x885   :  { %v786_v43 = vpop.eup %785 }
 0x886   :  { %494 = vrot.lane.b32.xlu0 %v786_v43, %s884_s3 }
 0x8f8   :  { %v495_v44 = vpop.permute.xlu0 %494 }
 0x8f9   :  { %v497_v45 = vmul.f32 %v784_v34, %v495_v44 }
 0x8fb   :  { %508 = vrot.lane.b32.xlu1 %v497_v45, %s884_s3 }
 0x96d   :  { %v509_v46 = vpop.permute.xlu1 %508 }
 0x96e   :  { %712 = vmatmul.mubr.msk.f32.vlgmr.msra.gmra.mrb[4].mxu0 %vm100_vm2, %v509_v46 }
 0xa41   :  { %v578_v49 = vpop.f32.mrb[4].mxu0 }
 0xa42   :  { %v579_v50 = vadd.f32 %v578_v49, %v506_v48  ;;  %v713_v51 = vpop.f32.mrb[5].mxu0 }
 0xa44   :  { %582 = vmax.xlane.f32.xlu0 %v579_v50 }
 0xad1   :  { %v583_v3 = vpop.xlane.xlu0 %582 }
 0xad2   :  { %v584_v52 = vsub.f32 %v579_v50, %v583_v3 }
 0xad4   :  { %v585_v53 = vmul.f32 1.442695, %v584_v52 }
 0xad6   :  { %787 = vpow2.f32 %v585_v53 }
 0xae0   :  { %v788_v54 = vpop.eup %787 }
 0xae1   :  { %587 = vadd.xlane.f32.xlu1 %v788_v54 }
 0xb6e   :  { %v588_v55 = vpop.xlane.xlu1 %587 }
 0xb6f   :  { %789 = vlog2.f32 %v588_v55 }
 0xb79   :  { %v790_v56 = vpop.eup %789 }
 0xb7a   :  { %v590_v57 = vmul.f32 0.6931472, %v790_v56 }
 0xb7c   :  { %v591_v58 = vsub.f32 %v584_v52, %v590_v57 }
 0xb7e   :  { %592 = vst [vmem:[#allocation10] sm:$0xff] %v591_v58 }
 0xb7f   :  { %856 = shalt.err (!%p853_p9)
}
 0xb80   :  { %s857_s19 = scalar_lea.hbm %s1025_s4, 128 }
 0xb81   :  { %p858_p10 = scmp.ne.s32.totalorder %s1025_s4, %s857_s19  ;;  %p861_p11 = scmp.lt.u32.totalorder %s857_s19, %s1025_s4 }
 0xb83   :  { %p863_p12 = pnand %p861_p11, %p858_p10 }
 0xb85   :  { %866 = shalt.err (!%p863_p12)
}
 0xb86   :  { %602 = dma.vmem_to_hbm [thread:$0]  %s600_s15, 128, %s1025_s4, [#allocation5]  }
 0xb87   :  { %873 = dma.done.wait [#allocation5], 128  }
 0xb88   :  { %874 = vsyncadd [#allocation5], 4294967168 }
 0xb89   :  { %606 = vsyncpa [#allocation4], 1 }
 0xb8a   :  { %607 = vsyncpa [#allocation9], 1 }
 0xb8b   :  { %608 = vsyncpa [#allocation5], 1 }
 0xb8c   :  { %609 = vsyncpa [#allocation6], 1 }

</bundles_post_ra>
